<compile_context>
chip_gen: v7x
topology: tpu7x:2x2x1
jax: 0.10.0
libtpu: 0.0.40
codegen_flags: <defaults>
</compile_context>

<pallas_src>
import jax
import jax.numpy as jnp
from jax.experimental import pallas as pl
from jax.experimental.pallas import tpu as pltpu

EPS = 1e-6


def snf_kernel(z_ref, u_ref, w_ref, b_ref, g_ref, z_out_ref, logdet_ref):
    """Applies all K planar-flow layers to one batch tile.

    z_ref     : (tb, D) VMEM   input zs tile
    u_ref     : (K, D)  VMEM   stacked u vectors (resident: constant block index)
    w_ref     : (K, D)  VMEM   stacked w vectors (resident)
    b_ref     : (K,)    SMEM   per-layer bias
    g_ref     : (K, K)  SMEM   Gram matrix G[j, k] = u_j . w_k (wrapper-precomputed)
    z_out_ref : (tb, D) VMEM   output zs tile
    logdet_ref: (1, tb) VMEM   per-sample log-determinant (lane-dense row)
    """
    num_layers = u_ref.shape[0]

    # ---- MXU pass 1: every D-wide reduction at once -------------------------
    # A0T[k, b] = w_k . z0_b  (NT matmul). Batch ends up on the 128 lanes, so all
    # per-layer elementwise work below is lane-dense regardless of D.
    a0t = jax.lax.dot_general(
        w_ref[...], z_ref[...],
        dimension_numbers=(((1,), (1,)), ((), ())),
        preferred_element_type=jnp.float32)                      # (K, tb) f32

    # ---- scalar recurrence over layers (O(tb * K^2) VPU work) ----------------
    # z_k = z_0 + sum_{j<k} h_j u_j  =>  a_k = w_k.z_0 + b_k + sum_{j<k} h_j G[j,k]
    hs = []
    logdet = jnp.zeros((1, a0t.shape[1]), jnp.float32)           # (1, tb)
    for k in range(num_layers):                                  # static unroll
        a_k = a0t[k:k + 1, :] + b_ref[k]                         # (1, tb) + SMEM scalar
        for j in range(k):
            a_k = a_k + g_ref[j, k] * hs[j]                      # SMEM-scalar fma
        h_k = jnp.tanh(a_k)                                      # EUP
        hs.append(h_k)
        det_k = 1.0 + g_ref[k, k] * (1.0 - h_k * h_k)            # (1, tb)
        logdet = logdet + jnp.log(jnp.abs(det_k) + EPS)

    # ---- MXU pass 2: every D-wide update at once -----------------------------
    # z_out = z0 + H @ U  ==  z0 + Ht^T @ U   (TN matmul).
    ht = jnp.concatenate(hs, axis=0)                             # (K, tb)
    dz = jax.lax.dot_general(
        ht.astype(u_ref.dtype), u_ref[...],
        dimension_numbers=(((0,), (0,)), ((), ())),
        preferred_element_type=jnp.float32)                      # (tb, D) f32
    # Re-read z0 here (cheap VMEM vld) so the (tb, D) tile is never live across
    # the layer recurrence -> bounded vreg pressure even for large tiles.
    z_out_ref[...] = (z_ref[...].astype(jnp.float32) + dz).astype(z_out_ref.dtype)
    logdet_ref[...] = logdet                                     # unmasked, lane-dense


def _vmem_limit_bytes():
    """Scoped-VMEM request derived from the chip's physical VMEM when queryable.
    v5e/v6e (128 MiB physical) -> ~96 MiB, v7x (64 MiB physical) -> ~48 MiB."""
    try:
        cap = pltpu.get_tpu_info().vmem_capacity_bytes
    except Exception:
        cap = 64 << 20                       # conservative (v7x-sized) fallback
    return int(min(cap * 3 // 4, 100 << 20))


def _pick_batch_tile(B, D, itemsize, budget_bytes):
    """Rows of the batch per grid step.

    Real per-step VMEM footprint ~= 4x the tile bytes (double-buffered input tile
    + double-buffered output tile; input_output_aliases shares HBM, not VMEM) plus
    the small resident (K, D) U/W blocks. Multi-tile runs use multiple-of-128 tiles
    (keeps the (1, batch_tile) logdet blocks and (batch_tile, D) z blocks aligned);
    the wrapper pads the batch up to a tile multiple.
    """
    per_row = 4 * D * itemsize
    fits = B * per_row <= budget_bytes
    if fits and B < 256:
        return B                              # single tile; blocks == full array dims
    by_budget = max(128, (budget_bytes // max(per_row, 1)) // 128 * 128)
    by_cores = max(128, (B // 2) // 128 * 128)   # >=2 grid steps for dual-TC (v7x)
    return min(by_budget, by_cores)


def snf_forward(zs, U, W, bias, *, batch_tile=None, donate_zs=False):
    """K-layer planar-flow SNF forward pass.

    Returns (zs_out (B, D) in zs.dtype, logdet (B,) float32).

    zs/U/W may be float32 or bfloat16 (bf16 halves HBM traffic and uses the bf16
    MXU path on v6e/v7x); the recurrence and logdet accumulate in f32 either way.
    Set donate_zs=True to alias the zs buffer into the output (saves an HBM
    buffer, but the caller must not reuse zs afterwards).
    """
    B, D = zs.shape
    K = U.shape[0]

    compute_dtype = zs.dtype
    U = U.astype(compute_dtype)
    W = W.astype(compute_dtype)
    bias_f32 = bias.astype(jnp.float32).reshape(K)
    # Gram matrix G[j, k] = u_j . w_k, computed exactly in f32 on the VPU in the
    # wrapper (tiny: K x K x D), so logdet's u.w has no MXU rounding.
    G = jnp.sum(U.astype(jnp.float32)[:, None, :] * W.astype(jnp.float32)[None, :, :],
                axis=-1)                                         # (K, K)

    vmem_limit = _vmem_limit_bytes()
    if batch_tile is None:
        batch_tile = _pick_batch_tile(B, D, jnp.dtype(compute_dtype).itemsize,
                                      budget_bytes=(vmem_limit * 3) // 4)
    num_bt = pl.cdiv(B, batch_tile)
    B_pad = num_bt * batch_tile
    zs_in = zs if B_pad == B else jnp.pad(zs, ((0, B_pad - B), (0, 0)))

    z_out, logdet_row = pl.pallas_call(
        snf_kernel,
        out_shape=(
            jax.ShapeDtypeStruct((B_pad, D), compute_dtype),
            jax.ShapeDtypeStruct((1, B_pad), jnp.float32),       # lane-dense logdet
        ),
        grid=(num_bt,),
        in_specs=[
            pl.BlockSpec((batch_tile, D), lambda i: (i, 0)),     # zs tile
            pl.BlockSpec((K, D), lambda i: (0, 0)),              # U (resident)
            pl.BlockSpec((K, D), lambda i: (0, 0)),              # W (resident)
            pl.BlockSpec(memory_space=pltpu.MemorySpace.SMEM),   # bias (K,)
            pl.BlockSpec(memory_space=pltpu.MemorySpace.SMEM),   # G (K, K)
        ],
        out_specs=(
            pl.BlockSpec((batch_tile, D), lambda i: (i, 0)),     # zs out tile
            pl.BlockSpec((1, batch_tile), lambda i: (0, i)),     # logdet row tile
        ),
        input_output_aliases=({0: 0} if donate_zs else {}),
        compiler_params=pltpu.CompilerParams(
            dimension_semantics=("parallel",),                   # batch tiles
            vmem_limit_bytes=vmem_limit,
        ),
    )(zs_in, U, W, bias_f32, G)

    return z_out[:B], logdet_row[0, :B]


def snf_forward_ref(zs, U, W, bias):
    """Pure-JAX reference mirroring SNF.forward with planar-flow layers, written
    with exact f32 elementwise reductions (no MXU) so it is precision-unambiguous."""
    zs = zs.astype(jnp.float32)
    U = U.astype(jnp.float32)
    W = W.astype(jnp.float32)
    bias = bias.astype(jnp.float32)
    logdet = jnp.zeros((zs.shape[0],), jnp.float32)
    for k in range(U.shape[0]):
        a = jnp.sum(zs * W[k][None, :], axis=-1) + bias[k]
        h = jnp.tanh(a)
        zs = zs + h[:, None] * U[k][None, :]
        uw = jnp.sum(U[k] * W[k])
        det = 1.0 + uw * (1.0 - h * h)
        logdet = logdet + jnp.log(jnp.abs(det) + EPS)
    return zs, logdet


if __name__ == "__main__":
    # Small, deterministic example shapes.
    B, D, K = 8, 32, 4   # batch, latent dim, number of flow layers

    key = jax.random.PRNGKey(0)
    kz, ku, kw, kb = jax.random.split(key, 4)
    zs = jax.random.normal(kz, (B, D), dtype=jnp.float32)
    U = 0.1 * jax.random.normal(ku, (K, D), dtype=jnp.float32)
    W = 0.1 * jax.random.normal(kw, (K, D), dtype=jnp.float32)
    bias = 0.1 * jax.random.normal(kb, (K,), dtype=jnp.float32)

    z_out, logdet = snf_forward(zs, U, W, bias)            # zs is not donated
    z_out, logdet = jax.block_until_ready((z_out, logdet))

    z_exp, ld_exp = snf_forward_ref(zs, U, W, bias)
    z_exp, ld_exp = jax.block_until_ready((z_exp, ld_exp))

    # Tolerance allows for MXU f32 matmul pass-decomposition rounding; values are
    # O(1), so this is still a meaningful functional check.
    assert jnp.allclose(z_out, z_exp, atol=2e-3, rtol=2e-3), "zs mismatch"
    assert jnp.allclose(logdet, ld_exp, atol=2e-3, rtol=2e-3), "logdet mismatch"

    # TODO(synk): original SNF ships with an empty layer list; concrete planar-flow
    # layers are instantiated here so the container's loop has real compute.
    print("KERNEL_OK")
</pallas_src>

<mosaic_0001>
module attributes {stable_mosaic.version = 11 : i64} {
  func.func @snf_kernel(%arg0: i32, %arg1: memref<8x32xf32, #tpu.memory_space<vmem>>, %arg2: memref<4x32xf32, #tpu.memory_space<vmem>>, %arg3: memref<4x32xf32, #tpu.memory_space<vmem>>, %arg4: memref<4xf32, #tpu.memory_space<smem>>, %arg5: memref<4x4xf32, #tpu.memory_space<smem>>, %arg6: memref<8x32xf32, #tpu.memory_space<vmem>>, %arg7: memref<1x8xf32, #tpu.memory_space<vmem>>) attributes {dimension_semantics = [#tpu.dimension_semantics<parallel>], iteration_bounds = array<i64: 1>, scalar_prefetch = 0 : i64, scratch_operands = 0 : i64, tpu.core_type = #tpu.core_type<tc>, window_params = [{transform_indices = @transform_0, window_bounds = array<i64: 8, 32>}, {pipeline_mode = #tpu.pipeline_mode<synchronous>, transform_indices = @transform_1, window_bounds = array<i64: 4, 32>}, {pipeline_mode = #tpu.pipeline_mode<synchronous>, transform_indices = @transform_2, window_bounds = array<i64: 4, 32>}, {transform_indices = @transform_3, window_bounds = array<i64: 4>}, {transform_indices = @transform_4, window_bounds = array<i64: 4, 4>}, {transform_indices = @transform_5, window_bounds = array<i64: 8, 32>}, {transform_indices = @transform_6, window_bounds = array<i64: 1, 8>}]} {
    %c0 = arith.constant 0 : index
    %c0_0 = arith.constant 0 : index
    %0 = vector.load %arg3[%c0, %c0_0] : memref<4x32xf32, #tpu.memory_space<vmem>>, vector<4x32xf32>
    %c0_1 = arith.constant 0 : index
    %c0_2 = arith.constant 0 : index
    %1 = vector.load %arg1[%c0_1, %c0_2] : memref<8x32xf32, #tpu.memory_space<vmem>>, vector<8x32xf32>
    %cst = arith.constant dense<0.000000e+00> : vector<4x8xf32>
    %2 = tpu.matmul %0, %1, %cst {dimension_numbers = #tpu.dot_dimension_numbers<[1], [1], [0], [0], [0, 0, 1, 0], [], []>} : vector<4x32xf32>, vector<8x32xf32>, vector<4x8xf32> -> vector<4x8xf32>
    %cst_3 = arith.constant 0.000000e+00 : f32
    %3 = vector.broadcast %cst_3 : f32 to vector<1x8xf32>
    %4 = vector.extract_strided_slice %2 {offsets = [0, 0], sizes = [1, 8], strides = [1, 1]} : vector<4x8xf32> to vector<1x8xf32>
    %c0_4 = arith.constant 0 : index
    %5 = memref.load %arg4[%c0_4] : memref<4xf32, #tpu.memory_space<smem>>
    %6 = vector.broadcast %5 : f32 to vector<1x8xf32>
    %7 = arith.addf %4, %6 : vector<1x8xf32>
    %8 = math.tanh %7 : vector<1x8xf32>
    %c0_5 = arith.constant 0 : index
    %c0_6 = arith.constant 0 : index
    %9 = memref.load %arg5[%c0_5, %c0_6] : memref<4x4xf32, #tpu.memory_space<smem>>
    %10 = arith.mulf %8, %8 : vector<1x8xf32>
    %cst_7 = arith.constant 1.000000e+00 : f32
    %11 = vector.broadcast %cst_7 : f32 to vector<1x8xf32>
    %12 = arith.subf %11, %10 : vector<1x8xf32>
    %13 = vector.broadcast %9 : f32 to vector<1x8xf32>
    %14 = arith.mulf %13, %12 : vector<1x8xf32>
    %cst_8 = arith.constant 1.000000e+00 : f32
    %15 = vector.broadcast %cst_8 : f32 to vector<1x8xf32>
    %16 = arith.addf %15, %14 : vector<1x8xf32>
    %17 = math.absf %16 : vector<1x8xf32>
    %cst_9 = arith.constant 9.99999997E-7 : f32
    %18 = vector.broadcast %cst_9 : f32 to vector<1x8xf32>
    %19 = arith.addf %17, %18 : vector<1x8xf32>
    %20 = math.log %19 : vector<1x8xf32>
    %21 = arith.addf %3, %20 : vector<1x8xf32>
    %22 = vector.extract_strided_slice %2 {offsets = [1, 0], sizes = [1, 8], strides = [1, 1]} : vector<4x8xf32> to vector<1x8xf32>
    %c1 = arith.constant 1 : index
    %23 = memref.load %arg4[%c1] : memref<4xf32, #tpu.memory_space<smem>>
    %24 = vector.broadcast %23 : f32 to vector<1x8xf32>
    %25 = arith.addf %22, %24 : vector<1x8xf32>
    %c0_10 = arith.constant 0 : index
    %c1_11 = arith.constant 1 : index
    %26 = memref.load %arg5[%c0_10, %c1_11] : memref<4x4xf32, #tpu.memory_space<smem>>
    %27 = vector.broadcast %26 : f32 to vector<1x8xf32>
    %28 = arith.mulf %27, %8 : vector<1x8xf32>
    %29 = arith.addf %25, %28 : vector<1x8xf32>
    %30 = math.tanh %29 : vector<1x8xf32>
    %c1_12 = arith.constant 1 : index
    %c1_13 = arith.constant 1 : index
    %31 = memref.load %arg5[%c1_12, %c1_13] : memref<4x4xf32, #tpu.memory_space<smem>>
    %32 = arith.mulf %30, %30 : vector<1x8xf32>
    %cst_14 = arith.constant 1.000000e+00 : f32
    %33 = vector.broadcast %cst_14 : f32 to vector<1x8xf32>
    %34 = arith.subf %33, %32 : vector<1x8xf32>
    %35 = vector.broadcast %31 : f32 to vector<1x8xf32>
    %36 = arith.mulf %35, %34 : vector<1x8xf32>
    %cst_15 = arith.constant 1.000000e+00 : f32
    %37 = vector.broadcast %cst_15 : f32 to vector<1x8xf32>
    %38 = arith.addf %37, %36 : vector<1x8xf32>
    %39 = math.absf %38 : vector<1x8xf32>
    %cst_16 = arith.constant 9.99999997E-7 : f32
    %40 = vector.broadcast %cst_16 : f32 to vector<1x8xf32>
    %41 = arith.addf %39, %40 : vector<1x8xf32>
    %42 = math.log %41 : vector<1x8xf32>
    %43 = arith.addf %21, %42 : vector<1x8xf32>
    %44 = vector.extract_strided_slice %2 {offsets = [2, 0], sizes = [1, 8], strides = [1, 1]} : vector<4x8xf32> to vector<1x8xf32>
    %c2 = arith.constant 2 : index
    %45 = memref.load %arg4[%c2] : memref<4xf32, #tpu.memory_space<smem>>
    %46 = vector.broadcast %45 : f32 to vector<1x8xf32>
    %47 = arith.addf %44, %46 : vector<1x8xf32>
    %c0_17 = arith.constant 0 : index
    %c2_18 = arith.constant 2 : index
    %48 = memref.load %arg5[%c0_17, %c2_18] : memref<4x4xf32, #tpu.memory_space<smem>>
    %49 = vector.broadcast %48 : f32 to vector<1x8xf32>
    %50 = arith.mulf %49, %8 : vector<1x8xf32>
    %51 = arith.addf %47, %50 : vector<1x8xf32>
    %c1_19 = arith.constant 1 : index
    %c2_20 = arith.constant 2 : index
    %52 = memref.load %arg5[%c1_19, %c2_20] : memref<4x4xf32, #tpu.memory_space<smem>>
    %53 = vector.broadcast %52 : f32 to vector<1x8xf32>
    %54 = arith.mulf %53, %30 : vector<1x8xf32>
    %55 = arith.addf %51, %54 : vector<1x8xf32>
    %56 = math.tanh %55 : vector<1x8xf32>
    %c2_21 = arith.constant 2 : index
    %c2_22 = arith.constant 2 : index
    %57 = memref.load %arg5[%c2_21, %c2_22] : memref<4x4xf32, #tpu.memory_space<smem>>
    %58 = arith.mulf %56, %56 : vector<1x8xf32>
    %cst_23 = arith.constant 1.000000e+00 : f32
    %59 = vector.broadcast %cst_23 : f32 to vector<1x8xf32>
    %60 = arith.subf %59, %58 : vector<1x8xf32>
    %61 = vector.broadcast %57 : f32 to vector<1x8xf32>
    %62 = arith.mulf %61, %60 : vector<1x8xf32>
    %cst_24 = arith.constant 1.000000e+00 : f32
    %63 = vector.broadcast %cst_24 : f32 to vector<1x8xf32>
    %64 = arith.addf %63, %62 : vector<1x8xf32>
    %65 = math.absf %64 : vector<1x8xf32>
    %cst_25 = arith.constant 9.99999997E-7 : f32
    %66 = vector.broadcast %cst_25 : f32 to vector<1x8xf32>
    %67 = arith.addf %65, %66 : vector<1x8xf32>
    %68 = math.log %67 : vector<1x8xf32>
    %69 = arith.addf %43, %68 : vector<1x8xf32>
    %70 = vector.extract_strided_slice %2 {offsets = [3, 0], sizes = [1, 8], strides = [1, 1]} : vector<4x8xf32> to vector<1x8xf32>
    %c3 = arith.constant 3 : index
    %71 = memref.load %arg4[%c3] : memref<4xf32, #tpu.memory_space<smem>>
    %72 = vector.broadcast %71 : f32 to vector<1x8xf32>
    %73 = arith.addf %70, %72 : vector<1x8xf32>
    %c0_26 = arith.constant 0 : index
    %c3_27 = arith.constant 3 : index
    %74 = memref.load %arg5[%c0_26, %c3_27] : memref<4x4xf32, #tpu.memory_space<smem>>
    %75 = vector.broadcast %74 : f32 to vector<1x8xf32>
    %76 = arith.mulf %75, %8 : vector<1x8xf32>
    %77 = arith.addf %73, %76 : vector<1x8xf32>
    %c1_28 = arith.constant 1 : index
    %c3_29 = arith.constant 3 : index
    %78 = memref.load %arg5[%c1_28, %c3_29] : memref<4x4xf32, #tpu.memory_space<smem>>
    %79 = vector.broadcast %78 : f32 to vector<1x8xf32>
    %80 = arith.mulf %79, %30 : vector<1x8xf32>
    %81 = arith.addf %77, %80 : vector<1x8xf32>
    %c2_30 = arith.constant 2 : index
    %c3_31 = arith.constant 3 : index
    %82 = memref.load %arg5[%c2_30, %c3_31] : memref<4x4xf32, #tpu.memory_space<smem>>
    %83 = vector.broadcast %82 : f32 to vector<1x8xf32>
    %84 = arith.mulf %83, %56 : vector<1x8xf32>
    %85 = arith.addf %81, %84 : vector<1x8xf32>
    %86 = math.tanh %85 : vector<1x8xf32>
    %c3_32 = arith.constant 3 : index
    %c3_33 = arith.constant 3 : index
    %87 = memref.load %arg5[%c3_32, %c3_33] : memref<4x4xf32, #tpu.memory_space<smem>>
    %88 = arith.mulf %86, %86 : vector<1x8xf32>
    %cst_34 = arith.constant 1.000000e+00 : f32
    %89 = vector.broadcast %cst_34 : f32 to vector<1x8xf32>
    %90 = arith.subf %89, %88 : vector<1x8xf32>
    %91 = vector.broadcast %87 : f32 to vector<1x8xf32>
    %92 = arith.mulf %91, %90 : vector<1x8xf32>
    %cst_35 = arith.constant 1.000000e+00 : f32
    %93 = vector.broadcast %cst_35 : f32 to vector<1x8xf32>
    %94 = arith.addf %93, %92 : vector<1x8xf32>
    %95 = math.absf %94 : vector<1x8xf32>
    %cst_36 = arith.constant 9.99999997E-7 : f32
    %96 = vector.broadcast %cst_36 : f32 to vector<1x8xf32>
    %97 = arith.addf %95, %96 : vector<1x8xf32>
    %98 = math.log %97 : vector<1x8xf32>
    %99 = arith.addf %69, %98 : vector<1x8xf32>
    %100 = tpu.concatenate %8, %30, %56, %86 in 0 : vector<1x8xf32>, vector<1x8xf32>, vector<1x8xf32>, vector<1x8xf32> -> vector<4x8xf32>
    %c0_37 = arith.constant 0 : index
    %c0_38 = arith.constant 0 : index
    %101 = vector.load %arg2[%c0_37, %c0_38] : memref<4x32xf32, #tpu.memory_space<vmem>>, vector<4x32xf32>
    %cst_39 = arith.constant dense<0.000000e+00> : vector<8x32xf32>
    %102 = tpu.matmul %100, %101, %cst_39 {dimension_numbers = #tpu.dot_dimension_numbers<[0], [0], [1], [1], [0, 1, 1, 1], [], []>} : vector<4x8xf32>, vector<4x32xf32>, vector<8x32xf32> -> vector<8x32xf32>
    %c0_40 = arith.constant 0 : index
    %c0_41 = arith.constant 0 : index
    %103 = vector.load %arg1[%c0_40, %c0_41] : memref<8x32xf32, #tpu.memory_space<vmem>>, vector<8x32xf32>
    %104 = arith.addf %103, %102 : vector<8x32xf32>
    %c0_42 = arith.constant 0 : index
    %c0_43 = arith.constant 0 : index
    %105 = vector.load %arg6[%c0_42, %c0_43] : memref<8x32xf32, #tpu.memory_space<vmem>>, vector<8x32xf32>
    tpu.vector_store %arg6[%c0_42, %c0_43], %104 {strides = array<i32>} : memref<8x32xf32, #tpu.memory_space<vmem>>, vector<8x32xf32>,
    %c0_44 = arith.constant 0 : index
    %c0_45 = arith.constant 0 : index
    %106 = vector.load %arg7[%c0_44, %c0_45] : memref<1x8xf32, #tpu.memory_space<vmem>>, vector<1x8xf32>
    tpu.vector_store %arg7[%c0_44, %c0_45], %99 {strides = array<i32>} : memref<1x8xf32, #tpu.memory_space<vmem>>, vector<1x8xf32>,
    return
  }
  func.func @transform_0(%arg0: i32) -> (i32, i32) {
    %c0_i32 = arith.constant 0 : i32
    %c0_i32_0 = arith.constant 0 : i32
    return %arg0, %c0_i32 : i32, i32
  }
  func.func @transform_1(%arg0: i32) -> (i32, i32) {
    %c0_i32 = arith.constant 0 : i32
    %c0_i32_0 = arith.constant 0 : i32
    %c0_i32_1 = arith.constant 0 : i32
    return %c0_i32, %c0_i32_0 : i32, i32
  }
  func.func @transform_2(%arg0: i32) -> (i32, i32) {
    %c0_i32 = arith.constant 0 : i32
    %c0_i32_0 = arith.constant 0 : i32
    %c0_i32_1 = arith.constant 0 : i32
    return %c0_i32, %c0_i32_0 : i32, i32
  }
  func.func @transform_3(%arg0: i32) -> i32 {
    %c0_i32 = arith.constant 0 : i32
    %c0_i32_0 = arith.constant 0 : i32
    return %c0_i32 : i32
  }
  func.func @transform_4(%arg0: i32) -> (i32, i32) {
    %c0_i32 = arith.constant 0 : i32
    %c0_i32_0 = arith.constant 0 : i32
    %c0_i32_1 = arith.constant 0 : i32
    return %c0_i32, %c0_i32_0 : i32, i32
  }
  func.func @transform_5(%arg0: i32) -> (i32, i32) {
    %c0_i32 = arith.constant 0 : i32
    %c0_i32_0 = arith.constant 0 : i32
    return %arg0, %c0_i32 : i32, i32
  }
  func.func @transform_6(%arg0: i32) -> (i32, i32) {
    %c0_i32 = arith.constant 0 : i32
    %c0_i32_0 = arith.constant 0 : i32
    return %c0_i32, %arg0 : i32, i32
  }
}

</mosaic_0001>

<bundles_post_ra>
// kernel: tpu_custom_call.1
= control target key start
LH: loop header
LB: loop body
LE: loop exit
PB: predicated region body
PF: predicated region fallthrough
CT: control target
= control target key end

     0   :  { %12 = vsyncpa [#allocation3], 0  ;;  %s709_s0 = inlined_call_operand.hbm [shape: f32[8,32], index: 0, kind: input, shape index: {}]   ;;  %s710_s1 = inlined_call_operand.hbm [shape: f32[4,32], index: 1, kind: input, shape index: {}]   ;;  %s711_s2 = inlined_call_operand.vmem [shape: f32[4,32], index: 2, kind: input, shape index: {}]   ;;  %s712_s3 = inlined_call_operand.vmem [shape: f32[4], index: 3, kind: input, shape index: {}]   ;;  %s713_s4 = inlined_call_operand.vmem [shape: f32[4,4], index: 4, kind: input, shape index: {}]   ;;  %s714_s5 = inlined_call_operand.hbm [shape: f32[8,32], index: 5, kind: output, shape index: {0}]   ;;  %s715_s6 = inlined_call_operand.hbm [shape: f32[1,8], index: 6, kind: output, shape index: {1}]  }
   0x1   :  { %13 = vsyncpa [#allocation7], 0 }
   0x2   :  { %14 = vsyncpa [#allocation5], 0 }
   0x3   :  { %15 = vsyncpa [#allocation10], 0 }
   0x4   :  { %16 = vsyncpa [#allocation4], 0 }
   0x5   :  { %17 = vsyncpa [#allocation13], 0  ;;  %s594_s21 = smov [#allocation2]   ;;  %s595_s23 = smov [#allocation6]  }
   0x6   :  { %s24_s22 = sshll.u32 %s594_s21, 4  ;;  %s34_s24 = sshll.u32 %s595_s23, 4  ;;  %s25_s22 = int_to_ptr.vmem [resolvable:$true] %s24_s22  ;;  %s35_s24 = int_to_ptr.vmem [resolvable:$true] %s34_s24 }
   0x7   :  { %s470_s27 = scalar_lea.hbm %s709_s0, 128 }
   0x8   :  { %p471_p0 = scmp.ne.s32.totalorder %s709_s0, %s470_s27  ;;  %p474_p1 = scmp.lt.u32.totalorder %s470_s27, %s709_s0 }
   0xa   :  { %p476_p2 = pnand %p474_p1, %p471_p0 }
   0xc   :  { %479 = shalt.err (!%p476_p2)
}
   0xd   :  { %s480_s8 = scalar_lea.vmem %s25_s22, 128  ;;  %p485_p4 = scmp.lt.s32.totalorder %s25_s22, %s25_s22 }
   0xe   :  { %p481_p3 = scmp.ne.s32.totalorder %s25_s22, %s480_s8  ;;  %p486_p5 = scmp.lt.s32.totalorder %s480_s8, %s480_s8 }
  0x10   :  { %p487_p6 = por %p486_p5, %p485_p4 }
  0x12   :  { %p488_p7 = pnand %p487_p6, %p481_p3 }
  0x14   :  { %491 = shalt.err (!%p488_p7)
}
  0x15   :  { %27 = dma.hbm_to_vmem [thread:$0]  %s709_s0, 128, %s25_s22, [#allocation3]  }
  0x16   :  { %s492_s13 = scalar_lea.hbm %s710_s1, 64 }
  0x17   :  { %p493_p8 = scmp.ne.s32.totalorder %s710_s1, %s492_s13  ;;  %p496_p9 = scmp.lt.u32.totalorder %s492_s13, %s710_s1 }
  0x19   :  { %p498_p10 = pnand %p496_p9, %p493_p8 }
  0x1b   :  { %501 = shalt.err (!%p498_p10)
}
  0x1c   :  { %s502_s18 = scalar_lea.vmem %s35_s24, 64  ;;  %p507_p12 = scmp.lt.s32.totalorder %s35_s24, %s35_s24 }
  0x1d   :  { %p503_p11 = scmp.ne.s32.totalorder %s35_s24, %s502_s18  ;;  %p508_p13 = scmp.lt.s32.totalorder %s502_s18, %s502_s18 }
  0x1f   :  { %p509_p0 = por %p508_p13, %p507_p12 }
  0x21   :  { %p510_p1 = pnand %p509_p0, %p503_p11 }
  0x23   :  { %513 = shalt.err (!%p510_p1)
}
  0x24   :  { %37 = dma.hbm_to_vmem [thread:$0]  %s710_s1, 64, %s35_s24, [#allocation7]  }
  0x25   :  { %s46_s22 = sshll.u32 %s712_s3, 4  ;;  %s56_s26 = sshll.u32 %s713_s4, 4  ;;  %s47_s22 = int_to_ptr.vmem [resolvable:$true] %s46_s22  ;;  %s57_s26 = int_to_ptr.vmem [resolvable:$true] %s56_s26 }
  0x26   :  { %s514_s27 = scalar_lea.vmem %s47_s22, 16  ;;  %p519_p3 = scmp.lt.s32.totalorder %s47_s22, %s47_s22 }
  0x27   :  { %p515_p2 = scmp.ne.s32.totalorder %s47_s22, %s514_s27  ;;  %p520_p4 = scmp.lt.s32.totalorder %s514_s27, %s514_s27 }
  0x29   :  { %p521_p5 = por %p520_p4, %p519_p3 }
  0x2b   :  { %p522_p6 = pnand %p521_p5, %p515_p2 }
  0x2d   :  { %525 = shalt.err (!%p522_p6)
}
  0x2e   :  { %s596_s28 = smov [#allocation8]   ;;  %s526_s1 = scalar_lea.vmem %s57_s26, 64 }
  0x2f   :  { %49 = dma.vmem_to_smem %s47_s22, 16, %s596_s28, [#allocation5]  }
  0x30   :  { %p527_p7 = scmp.ne.s32.totalorder %s57_s26, %s526_s1  ;;  %p531_p8 = scmp.lt.s32.totalorder %s57_s26, %s57_s26 }
  0x31   :  { %p532_p9 = scmp.lt.s32.totalorder %s526_s1, %s526_s1 }
  0x33   :  { %p533_p10 = por %p532_p9, %p531_p8 }
  0x35   :  { %p534_p11 = pnand %p533_p10, %p527_p7 }
  0x37   :  { %537 = shalt.err (!%p534_p11)
}
  0x38   :  { %s597_s3 = smov [#allocation9]  }
  0x39   :  { %59 = dma.vmem_to_smem %s57_s26, 64, %s597_s3, [#allocation10]  }
  0x3a   :  { %582 = dma.done.wait [#allocation3], 128  }
  0x3b   :  { %583 = vsyncadd [#allocation3], 4294967168 }
  0x3c   :  { %584 = dma.done.wait [#allocation7], 64  }
  0x3d   :  { %585 = vsyncadd [#allocation7], 4294967232 }
  0x3e   :  { %586 = dma.done.wait [#allocation5], 16  }
  0x3f   :  { %587 = vsyncadd [#allocation5], 4294967280 }
  0x40   :  { %588 = dma.done.wait [#allocation10], 64  }
  0x41   :  { %589 = vsyncadd [#allocation10], 4294967232 }
  0x42   :  { %72 = sfence }
  0x43   :  { %v667_v0 = vld [vmem:[#allocation2] sm:$0xff]  ;;  %vm75_vm0 = vcmask 261120   ;;  %v598_v1 = vmov 0.0   ;;  %vm599_vm1 = vmmov 0   ;;  %v269_v3 = vld [vmem:[#allocation6] sm:$0xf] }
  0x44   :  { %436 = vmatprep.subr.mxu0 %v598_v1  ;;  %438 = vmatprep.mubr.msk.f32.mxu0 %vm599_vm1, %v598_v1  ;;  %v73_v2 = vld [vmem:[%s711_s2] sm:$0xf]  ;;  %vm306_vm2 = vcmask 1043456   ;;  %s152_s29 = sld [smem:[#allocation8]]  ;;  %s419_s30 = sld [smem:[#allocation9 + $0x1]]  ;;  %vm263_vm3 = vcmask 1040384  }
  0x45   :  { %437 = vmatpush3.xpose.msk.msra.mxu0 %vm75_vm0, %v667_v0  ;;  %441 = vmatprep.subr.mxu1 %v598_v1  ;;  %s418_s7 = sld [smem:[#allocation8 + $0x1]]  ;;  %s422_s2 = sld [smem:[#allocation9 + $0x2]]  ;;  %vm265_vm4 = vcmask 1041408   ;;  %vm267_vm5 = vcmask 1042432   ;;  %vm382_vm6 = vcmask 57344   ;;  %vm302_vm7 = vcmask 31744  }
  0x46   :  { %443 = vmatprep.mubr.msk.f32.mxu1 %vm599_vm1, %v598_v1  ;;  %442 = vmatpush3.msk.msra.mxu1 %vm306_vm2, %v269_v3  ;;  %s421_s8 = sld [smem:[#allocation8 + $0x2]]  ;;  %s426_s10 = sld [smem:[#allocation9 + $0x3]] }
  0x47   :  { %s423_s9 = sld [smem:[#allocation9 + $0x82]]  ;;  %s427_s11 = sld [smem:[#allocation9 + $0x83]] }
  0x48   :  { %439 = vmatmul.mubr.msk.f32.vlgmr.msra.gmra.mrb[0].mxu0 %vm75_vm0, %v73_v2  ;;  %s425_s12 = sld [smem:[#allocation8 + $0x3]]  ;;  %s420_s14 = sld [smem:[#allocation9 + $0x81]] }
  0x49   :  { %s428_s13 = sld [smem:[#allocation9 + $0x103]]  ;;  %s424_s15 = sld [smem:[#allocation9 + $0x102]] }
  0x4a   :  { %v153_v4 = vstv %s152_s29  ;;  %v171_v8 = vstv %s419_s30  ;;  %s156_s16 = sld [smem:[#allocation9]]  ;;  %s429_s17 = sld [smem:[#allocation9 + $0x183]] }
  0x4b   :  { %v168_v10 = vstv %s418_s7  ;;  %v196_v15 = vstv %s422_s2  ;;  %s600_s18 = smov [#allocation12]  }
  0x4c   :  { %v193_v17 = vstv %s421_s8  ;;  %v228_v26 = vstv %s426_s10  ;;  %s400_s0 = sshll.u32 %s600_s18, 4  ;;  %s401_s0 = int_to_ptr.vmem [resolvable:$true] %s400_s0 }
  0x4d   :  { %v203_v18 = vstv %s423_s9  ;;  %v235_v27 = vstv %s427_s11  ;;  %s538_s19 = scalar_lea.vmem %s401_s0, 16  ;;  %s542_s20 = scalar_lea.vmem %s401_s0, 32 }
  0x4e   :  { %v225_v30 = vstv %s425_s12  ;;  %v181_v40 = vstv %s420_s14  ;;  %p539_p12 = scmp.ne.s32.totalorder %s401_s0, %s538_s19  ;;  %p543_p13 = scmp.lt.s32.totalorder %s401_s0, %s401_s0 }
  0x4f   :  { %v242_v33 = vstv %s428_s13  ;;  %v213_v46 = vstv %s424_s15  ;;  %p544_p0 = scmp.lt.s32.totalorder %s542_s20, %s538_s19 }
  0x50   :  { %v159_v51 = vstv %s156_s16  ;;  %v252_v3 = vstv %s429_s17 }
  0x51   :  { %p545_p1 = por %p544_p0, %p543_p13 }
  0x53   :  { %p546_p2 = pnand %p545_p1, %p539_p12 }
 0x11b   :  { %v148_v5 = vpop.f32.mrb[0].mxu0 }
 0x11c   :  { %v154_v6 = vadd.f32 %v153_v4, %v148_v5  ;;  %v440_v7 = vpop.f32.mrb[1].mxu0  ;;  %v169_v12 = vadd.f32 %v168_v10, %v148_v5  ;;  %v194_v21 = vadd.f32 %v193_v17, %v148_v5  ;;  %v226_v34 = vadd.f32 %v225_v30, %v148_v5 }
 0x11e   :  { %454 = vtanh.f32 %v154_v6 }
 0x128   :  { %v675_v9 = vpop.eup %454 }
 0x129   :  { %v172_v11 = vmul.f32 %v675_v9, %v171_v8  ;;  %v197_v16 = vmul.f32 %v675_v9, %v196_v15  ;;  %v229_v28 = vmul.f32 %v675_v9, %v228_v26  ;;  %v157_v42 = vmul.f32 %v675_v9, %v675_v9 }
 0x12b   :  { %v174_v13 = vrot.slane %v172_v11, 7  ;;  %v199_v19 = vrot.slane %v197_v16, 6  ;;  %v231_v32 = vrot.slane %v229_v28, 5  ;;  %v158_v49 = vsub.f32 1.0, %v157_v42 }
 0x12d   :  { %v176_v14 = vadd.f32 %v174_v13, %v169_v12  ;;  %v201_v23 = vadd.f32 %v199_v19, %v194_v21  ;;  %v233_v38 = vadd.f32 %v231_v32, %v226_v34  ;;  %v160_v53 = vmul.f32 %v159_v51, %v158_v49 }
 0x12f   :  { %456 = vtanh.f32 %v176_v14  ;;  %v161_v56 = vadd.f32 1.0, %v160_v53 }
 0x131   :  { %v162_v63 = vand.u32 2147483647, %v161_v56 }
 0x133   :  { %v163_v5 = vadd.f32 1e-06, %v162_v63 }
 0x139   :  { %v457_v20 = vpop.eup %456 }
 0x13a   :  { %v204_v22 = vmul.f32 %v457_v20, %v203_v18  ;;  %v236_v29 = vmul.f32 %v457_v20, %v235_v27  ;;  %v179_v31 = vmul.f32 %v457_v20, %v457_v20  ;;  %v264_v58 = vsel %vm263_vm3, %v675_v9, %v457_v20 }
 0x13c   :  { %v206_v24 = vrot.slane %v204_v22, 7  ;;  %v238_v35 = vrot.slane %v236_v29, 6  ;;  %v180_v37 = vsub.f32 1.0, %v179_v31 }
 0x13e   :  { %v208_v25 = vadd.f32 %v206_v24, %v201_v23  ;;  %v240_v43 = vadd.f32 %v238_v35, %v233_v38  ;;  %v182_v47 = vmul.f32 %v181_v40, %v180_v37 }
 0x140   :  { %458 = vtanh.f32 %v208_v25  ;;  %v183_v52 = vadd.f32 1.0, %v182_v47 }
 0x142   :  { %v184_v55 = vand.u32 2147483647, %v183_v52 }
 0x144   :  { %v185_v59 = vadd.f32 1e-06, %v184_v55 }
 0x14a   :  { %v459_v36 = vpop.eup %458 }
 0x14b   :  { %v243_v39 = vmul.f32 %v459_v36, %v242_v33  ;;  %v211_v41 = vmul.f32 %v459_v36, %v459_v36  ;;  %v266_v61 = vsel %vm265_vm4, %v264_v58, %v459_v36 }
 0x14d   :  { %v245_v44 = vrot.slane %v243_v39, 7  ;;  %v212_v45 = vsub.f32 1.0, %v211_v41 }
 0x14f   :  { %v247_v48 = vadd.f32 %v245_v44, %v240_v43  ;;  %v214_v50 = vmul.f32 %v213_v46, %v212_v45 }
 0x151   :  { %460 = vtanh.f32 %v247_v48  ;;  %v215_v54 = vadd.f32 1.0, %v214_v50 }
 0x152   :  { %462 = vlog2.f32 %v185_v59 }
 0x153   :  { %v216_v57 = vand.u32 2147483647, %v215_v54 }
 0x155   :  { %v217_v1 = vadd.f32 1e-06, %v216_v57 }
 0x157   :  { %464 = vlog2.f32 %v217_v1 }
 0x158   :  { %466 = vlog2.f32 %v163_v5 }
 0x15b   :  { %v461_v60 = vpop.eup %460 }
 0x15c   :  { %v268_v62 = vsel %vm267_vm5, %v266_v61, %v461_v60  ;;  %v250_v2 = vmul.f32 %v461_v60, %v461_v60  ;;  %v463_v11 = vpop.eup %462 }
 0x15d   :  { %270 = vxpose.xlu0.b32.start.end [1/1] (short) (narrow) %v268_v62, 8  ;;  %v187_v12 = vmul.f32 0.6931472, %v463_v11 }
 0x15e   :  { %v251_v4 = vsub.f32 1.0, %v250_v2 }
 0x15f   :  { %v189_v15 = vrot.slane %v187_v12, 1 }
 0x160   :  { %v253_v6 = vmul.f32 %v252_v3, %v251_v4 }
 0x161   :  { %v465_v9 = vpop.eup %464 }
 0x162   :  { %v254_v7 = vadd.f32 1.0, %v253_v6  ;;  %v219_v13 = vmul.f32 0.6931472, %v465_v9  ;;  %v467_v14 = vpop.eup %466 }
 0x163   :  { %v165_v16 = vmul.f32 0.6931472, %v467_v14 }
 0x164   :  { %v255_v8 = vand.u32 2147483647, %v254_v7  ;;  %v221_v17 = vrot.slane %v219_v13, 2 }
 0x165   :  { %v191_v19 = vadd.f32 %v189_v15, %v165_v16 }
 0x166   :  { %v256_v10 = vadd.f32 1e-06, %v255_v8 }
 0x167   :  { %v223_v21 = vadd.f32 %v221_v17, %v191_v19 }
 0x168   :  { %468 = vlog2.f32 %v256_v10 }
 0x172   :  { %v469_v18 = vpop.eup %468 }
 0x173   :  { %v258_v20 = vmul.f32 0.6931472, %v469_v18 }
 0x175   :  { %v260_v22 = vrot.slane %v258_v20, 3 }
 0x177   :  { %v262_v23 = vadd.f32 %v260_v22, %v223_v21 }
 0x179   :  { %383 = vst.msk [vmem:[#allocation12] sm:$0x1] %vm382_vm6, %v262_v23 }
 0x1dd   :  { %v286_v24 = vpop.trf.xlu0 }
 0x1de   :  { %444 = vmatmul.mubr.msk.f32.vlgmr.msra.gmra.mrb[0].mxu1 %vm302_vm7, %v286_v24 }
 0x1df   :  { %549 = shalt.err (!%p546_p2)
}
 0x1e0   :  { %s550_s23 = scalar_lea.hbm %s715_s6, 16 }
 0x1e1   :  { %p551_p3 = scmp.ne.s32.totalorder %s715_s6, %s550_s23  ;;  %p554_p4 = scmp.lt.u32.totalorder %s550_s23, %s715_s6 }
 0x1e3   :  { %p556_p5 = pnand %p554_p4, %p551_p3 }
 0x1e5   :  { %559 = shalt.err (!%p556_p5)
}
 0x1e6   :  { %403 = dma.vmem_to_hbm [thread:$0]  %s401_s0, 16, %s715_s6, [#allocation13]  }
 0x1e7   :  { %s601_s4 = smov [#allocation11]  }
 0x1e8   :  { %s390_s24 = sshll.u32 %s601_s4, 4  ;;  %s391_s24 = int_to_ptr.vmem [resolvable:$true] %s390_s24 }
 0x1e9   :  { %s560_s29 = scalar_lea.vmem %s391_s24, 128  ;;  %p565_p7 = scmp.lt.s32.totalorder %s391_s24, %s391_s24 }
 0x1ea   :  { %p561_p6 = scmp.ne.s32.totalorder %s391_s24, %s560_s29  ;;  %p566_p8 = scmp.lt.s32.totalorder %s560_s29, %s560_s29 }
 0x1ec   :  { %p567_p9 = por %p566_p8, %p565_p7 }
 0x1ee   :  { %p568_p10 = pnand %p567_p9, %p561_p6 }
 0x2b1   :  { %v376_v25 = vpop.f32.mrb[0].mxu1 }
 0x2b2   :  { %v380_v26 = vadd.f32 %v376_v25, %v667_v0  ;;  %v445_v27 = vpop.f32.mrb[1].mxu1 }
 0x2b4   :  { %381 = vst.msk [vmem:[#allocation11] sm:$0xff] %vm75_vm0, %v380_v26 }
 0x2b5   :  { %571 = shalt.err (!%p568_p10)
}
 0x2b6   :  { %s572_s6 = scalar_lea.hbm %s714_s5, 128 }
 0x2b7   :  { %p573_p11 = scmp.ne.s32.totalorder %s714_s5, %s572_s6  ;;  %p576_p12 = scmp.lt.u32.totalorder %s572_s6, %s714_s5 }
 0x2b9   :  { %p578_p13 = pnand %p576_p12, %p573_p11 }
 0x2bb   :  { %581 = shalt.err (!%p578_p13)
}
 0x2bc   :  { %393 = dma.vmem_to_hbm [thread:$0]  %s391_s24, 128, %s714_s5, [#allocation4]  }
 0x2bd   :  { %590 = dma.done.wait [#allocation4], 128  }
 0x2be   :  { %591 = vsyncadd [#allocation4], 4294967168 }
 0x2bf   :  { %592 = dma.done.wait [#allocation13], 16  }
 0x2c0   :  { %593 = vsyncadd [#allocation13], 4294967280 }
 0x2c1   :  { %410 = vsyncpa [#allocation3], 1 }
 0x2c2   :  { %411 = vsyncpa [#allocation7], 1 }
 0x2c3   :  { %412 = vsyncpa [#allocation4], 1 }
 0x2c4   :  { %413 = vsyncpa [#allocation13], 1 }
 0x2c5   :  { %414 = vsyncpa [#allocation5], 1 }
 0x2c6   :  { %415 = vsyncpa [#allocation10], 1 }

</bundles_post_ra>
